<compile_context>
chip_gen: v7x
topology: tpu7x:2x2x1
jax: 0.10.0
libtpu: 0.0.40
codegen_flags: <defaults>
</compile_context>

<pallas_src>
import functools

import jax
import jax.numpy as jnp
from jax.experimental import pallas as pl
from jax.experimental.pallas import tpu as pltpu


# ----------------------------- Pallas kernel ------------------------------ #
def _gather_rows_kernel(idx_ref, table_hbm, out_ref, row_buf, copy_sems, *,
                        block_rows):
    """Gather `block_rows` embedding rows from HBM into one VMEM output block.

    idx_ref:    (N_padded,) int32 in SMEM (scalar-prefetched token ids)
    table_hbm:  (V, E) embedding table left in HBM (memory_space=pl.ANY)
    out_ref:    (block_rows, E) VMEM output block for this grid step
    row_buf:    (block_rows, E) VMEM staging buffer for the DMA gather
    copy_sems:  (block_rows,) DMA semaphores
    """
    i = pl.program_id(0)
    base = i * block_rows

    # Issue all row DMAs first so they overlap, then wait on all of them.
    copies = []
    for r in range(block_rows):                       # static unroll
        row = idx_ref[base + r]                       # scalar read from SMEM
        cp = pltpu.make_async_copy(
            table_hbm.at[pl.ds(row, 1), :],           # (1, E) row in HBM
            row_buf.at[pl.ds(r, 1), :],               # (1, E) slot in VMEM
            copy_sems.at[r],
        )
        cp.start()
        copies.append(cp)
    for cp in copies:
        cp.wait()

    # Lane-dense (block_rows, E) store, E is a multiple of 128 -> unmasked vst.
    out_ref[...] = row_buf[...]


def embed_lookup(indices_flat, table, *, block_rows=8):
    """table[indices_flat] as a Pallas DMA row-gather (table stays in HBM)."""
    N = indices_flat.shape[0]
    V, E = table.shape

    # Clamp so a bad token id can never become an out-of-bounds DMA.
    # TODO(synk): nn.Embedding raises on out-of-range ids; we clamp instead.
    ids = jnp.clip(indices_flat.astype(jnp.int32), 0, V - 1)

    n_pad = pl.cdiv(N, block_rows) * block_rows
    if n_pad != N:
        ids = jnp.pad(ids, (0, n_pad - N))
    grid = (n_pad // block_rows,)

    kernel = functools.partial(_gather_rows_kernel, block_rows=block_rows)
    out = pl.pallas_call(
        kernel,
        out_shape=jax.ShapeDtypeStruct((n_pad, E), table.dtype),
        grid_spec=pltpu.PrefetchScalarGridSpec(
            num_scalar_prefetch=1,                    # ids -> SMEM
            grid=grid,
            in_specs=[pl.BlockSpec(memory_space=pl.ANY)],   # table stays in HBM
            out_specs=pl.BlockSpec((block_rows, E), lambda i, ids: (i, 0)),
            scratch_shapes=[
                pltpu.VMEM((block_rows, E), table.dtype),
                pltpu.SemaphoreType.DMA((block_rows,)),
            ],
        ),
        compiler_params=pltpu.CompilerParams(
            dimension_semantics=("parallel",),        # split blocks across TCs
        ),
    )(ids, table)

    return out[:N] if n_pad != N else out


# ------------------------------ Module glue ------------------------------- #
class Params:
    # word_is_char = True  => forward returns only the word embedding lookup
    word_is_char = True
    word_vocab_size = 64
    word_embed_size = 128
    char_vocab_size = 32
    char_embed_size = 16
    max_word_len = 8


def embedding_forward(params, word_embed_table, word_input, character_input=None):
    """
    Mirrors Embedding.forward:
      word_input:      [batch_size, seq_len]  int
      character_input: [batch_size, seq_len, max_word_len] int (unused when
                       params.word_is_char is True)
      returns:         [batch_size, seq_len, word_embed_size] float32
    """
    batch_size, seq_len = word_input.shape
    flat_ids = word_input.reshape(-1)
    word_emb = embed_lookup(flat_ids, word_embed_table)
    word_emb = word_emb.reshape(batch_size, seq_len, params.word_embed_size)

    if not params.word_is_char:
        # TODO(synk): char branch needs the external TDNN module, whose
        # definition is not part of the provided source; not implemented.
        raise NotImplementedError("TDNN definition not provided")

    return word_emb


# --------------------------------- Main ------------------------------------ #
if __name__ == "__main__":
    params = Params()
    key = jax.random.PRNGKey(0)
    k_tbl, k_wrd, k_chr = jax.random.split(key, 3)

    # Deterministic synthetic "word_embeddings.npy" replacement.
    word_embed_table = jax.random.normal(
        k_tbl, (params.word_vocab_size, params.word_embed_size), dtype=jnp.float32
    )

    batch_size, seq_len = 2, 8
    word_input = jax.random.randint(
        k_wrd, (batch_size, seq_len), 0, params.word_vocab_size, dtype=jnp.int32
    )
    character_input = jax.random.randint(
        k_chr, (batch_size, seq_len, params.max_word_len),
        0, params.char_vocab_size, dtype=jnp.int32,
    )

    out = embedding_forward(params, word_embed_table, word_input, character_input)
    out = jax.block_until_ready(out)

    # Sanity check against plain-JAX gather.
    ref = jnp.take(word_embed_table, word_input.reshape(-1), axis=0).reshape(
        batch_size, seq_len, params.word_embed_size
    )
    assert out.shape == (batch_size, seq_len, params.word_embed_size)
    assert jnp.allclose(out, ref, atol=1e-6), "mismatch vs reference gather"

    print("KERNEL_OK")
</pallas_src>

<mosaic_0001>
module attributes {stable_mosaic.version = 11 : i64} {
  func.func @_gather_rows_kernel(%arg0: i32, %arg1: memref<16xi32, #tpu.memory_space<smem>>, %arg2: memref<64x128xf32, #tpu.memory_space<any>>, %arg3: memref<8x128xf32, #tpu.memory_space<vmem>>, %arg4: memref<8x128xf32, #tpu.memory_space<vmem>>, %arg5: memref<8x!tpu.dma_semaphore, #tpu.memory_space<semaphore_mem>>) attributes {dimension_semantics = [#tpu.dimension_semantics<parallel>], iteration_bounds = array<i64: 2>, scalar_prefetch = 1 : i64, scratch_operands = 2 : i64, tpu.core_type = #tpu.core_type<tc>, window_params = [{}, {transform_indices = @transform_1, window_bounds = array<i64: 8, 128>}]} {
    %c8_i32 = arith.constant 8 : i32
    %0 = arith.muli %arg0, %c8_i32 : i32
    %c0_i32 = arith.constant 0 : i32
    %1 = arith.addi %0, %c0_i32 : i32
    %2 = arith.index_cast %1 : i32 to index
    %3 = memref.load %arg1[%2] : memref<16xi32, #tpu.memory_space<smem>>
    %c0_i32_0 = arith.constant 0 : i32
    %c0_i32_1 = arith.constant 0 : i32
    %4 = tpu.memref_slice %arg2[%3, %c0_i32_1] : memref<64x128xf32, #tpu.memory_space<any>> -> memref<1x128xf32, #tpu.memory_space<any>>
    %c0_i32_2 = arith.constant 0 : i32
    %c0_i32_3 = arith.constant 0 : i32
    %5 = tpu.memref_slice %arg4[%c0_i32_2, %c0_i32_3] : memref<8x128xf32, #tpu.memory_space<vmem>> -> memref<1x128xf32, #tpu.memory_space<vmem>>
    %6 = tpu.memref_slice %arg5[%c0_i32_0] : memref<8x!tpu.dma_semaphore, #tpu.memory_space<semaphore_mem>> -> memref<1x!tpu.dma_semaphore, #tpu.memory_space<semaphore_mem>>
    %7 = tpu.memref_squeeze %6 : memref<1x!tpu.dma_semaphore, #tpu.memory_space<semaphore_mem>> -> memref<!tpu.dma_semaphore, #tpu.memory_space<semaphore_mem>>
    tpu.enqueue_dma source(%4 : memref<1x128xf32, #tpu.memory_space<any>>) target(%5 : memref<1x128xf32, #tpu.memory_space<vmem>>) target_semaphore(%7 : memref<!tpu.dma_semaphore, #tpu.memory_space<semaphore_mem>>)
    %c1_i32 = arith.constant 1 : i32
    %8 = arith.addi %0, %c1_i32 : i32
    %9 = arith.index_cast %8 : i32 to index
    %10 = memref.load %arg1[%9] : memref<16xi32, #tpu.memory_space<smem>>
    %c1_i32_4 = arith.constant 1 : i32
    %c0_i32_5 = arith.constant 0 : i32
    %11 = tpu.memref_slice %arg2[%10, %c0_i32_5] : memref<64x128xf32, #tpu.memory_space<any>> -> memref<1x128xf32, #tpu.memory_space<any>>
    %c1_i32_6 = arith.constant 1 : i32
    %c0_i32_7 = arith.constant 0 : i32
    %12 = tpu.memref_slice %arg4[%c1_i32_6, %c0_i32_7] : memref<8x128xf32, #tpu.memory_space<vmem>> -> memref<1x128xf32, #tpu.memory_space<vmem>>
    %13 = tpu.memref_slice %arg5[%c1_i32_4] : memref<8x!tpu.dma_semaphore, #tpu.memory_space<semaphore_mem>> -> memref<1x!tpu.dma_semaphore, #tpu.memory_space<semaphore_mem>>
    %14 = tpu.memref_squeeze %13 : memref<1x!tpu.dma_semaphore, #tpu.memory_space<semaphore_mem>> -> memref<!tpu.dma_semaphore, #tpu.memory_space<semaphore_mem>>
    tpu.enqueue_dma source(%11 : memref<1x128xf32, #tpu.memory_space<any>>) target(%12 : memref<1x128xf32, #tpu.memory_space<vmem>>) target_semaphore(%14 : memref<!tpu.dma_semaphore, #tpu.memory_space<semaphore_mem>>)
    %c2_i32 = arith.constant 2 : i32
    %15 = arith.addi %0, %c2_i32 : i32
    %16 = arith.index_cast %15 : i32 to index
    %17 = memref.load %arg1[%16] : memref<16xi32, #tpu.memory_space<smem>>
    %c2_i32_8 = arith.constant 2 : i32
    %c0_i32_9 = arith.constant 0 : i32
    %18 = tpu.memref_slice %arg2[%17, %c0_i32_9] : memref<64x128xf32, #tpu.memory_space<any>> -> memref<1x128xf32, #tpu.memory_space<any>>
    %c2_i32_10 = arith.constant 2 : i32
    %c0_i32_11 = arith.constant 0 : i32
    %19 = tpu.memref_slice %arg4[%c2_i32_10, %c0_i32_11] : memref<8x128xf32, #tpu.memory_space<vmem>> -> memref<1x128xf32, #tpu.memory_space<vmem>>
    %20 = tpu.memref_slice %arg5[%c2_i32_8] : memref<8x!tpu.dma_semaphore, #tpu.memory_space<semaphore_mem>> -> memref<1x!tpu.dma_semaphore, #tpu.memory_space<semaphore_mem>>
    %21 = tpu.memref_squeeze %20 : memref<1x!tpu.dma_semaphore, #tpu.memory_space<semaphore_mem>> -> memref<!tpu.dma_semaphore, #tpu.memory_space<semaphore_mem>>
    tpu.enqueue_dma source(%18 : memref<1x128xf32, #tpu.memory_space<any>>) target(%19 : memref<1x128xf32, #tpu.memory_space<vmem>>) target_semaphore(%21 : memref<!tpu.dma_semaphore, #tpu.memory_space<semaphore_mem>>)
    %c3_i32 = arith.constant 3 : i32
    %22 = arith.addi %0, %c3_i32 : i32
    %23 = arith.index_cast %22 : i32 to index
    %24 = memref.load %arg1[%23] : memref<16xi32, #tpu.memory_space<smem>>
    %c3_i32_12 = arith.constant 3 : i32
    %c0_i32_13 = arith.constant 0 : i32
    %25 = tpu.memref_slice %arg2[%24, %c0_i32_13] : memref<64x128xf32, #tpu.memory_space<any>> -> memref<1x128xf32, #tpu.memory_space<any>>
    %c3_i32_14 = arith.constant 3 : i32
    %c0_i32_15 = arith.constant 0 : i32
    %26 = tpu.memref_slice %arg4[%c3_i32_14, %c0_i32_15] : memref<8x128xf32, #tpu.memory_space<vmem>> -> memref<1x128xf32, #tpu.memory_space<vmem>>
    %27 = tpu.memref_slice %arg5[%c3_i32_12] : memref<8x!tpu.dma_semaphore, #tpu.memory_space<semaphore_mem>> -> memref<1x!tpu.dma_semaphore, #tpu.memory_space<semaphore_mem>>
    %28 = tpu.memref_squeeze %27 : memref<1x!tpu.dma_semaphore, #tpu.memory_space<semaphore_mem>> -> memref<!tpu.dma_semaphore, #tpu.memory_space<semaphore_mem>>
    tpu.enqueue_dma source(%25 : memref<1x128xf32, #tpu.memory_space<any>>) target(%26 : memref<1x128xf32, #tpu.memory_space<vmem>>) target_semaphore(%28 : memref<!tpu.dma_semaphore, #tpu.memory_space<semaphore_mem>>)
    %c4_i32 = arith.constant 4 : i32
    %29 = arith.addi %0, %c4_i32 : i32
    %30 = arith.index_cast %29 : i32 to index
    %31 = memref.load %arg1[%30] : memref<16xi32, #tpu.memory_space<smem>>
    %c4_i32_16 = arith.constant 4 : i32
    %c0_i32_17 = arith.constant 0 : i32
    %32 = tpu.memref_slice %arg2[%31, %c0_i32_17] : memref<64x128xf32, #tpu.memory_space<any>> -> memref<1x128xf32, #tpu.memory_space<any>>
    %c4_i32_18 = arith.constant 4 : i32
    %c0_i32_19 = arith.constant 0 : i32
    %33 = tpu.memref_slice %arg4[%c4_i32_18, %c0_i32_19] : memref<8x128xf32, #tpu.memory_space<vmem>> -> memref<1x128xf32, #tpu.memory_space<vmem>>
    %34 = tpu.memref_slice %arg5[%c4_i32_16] : memref<8x!tpu.dma_semaphore, #tpu.memory_space<semaphore_mem>> -> memref<1x!tpu.dma_semaphore, #tpu.memory_space<semaphore_mem>>
    %35 = tpu.memref_squeeze %34 : memref<1x!tpu.dma_semaphore, #tpu.memory_space<semaphore_mem>> -> memref<!tpu.dma_semaphore, #tpu.memory_space<semaphore_mem>>
    tpu.enqueue_dma source(%32 : memref<1x128xf32, #tpu.memory_space<any>>) target(%33 : memref<1x128xf32, #tpu.memory_space<vmem>>) target_semaphore(%35 : memref<!tpu.dma_semaphore, #tpu.memory_space<semaphore_mem>>)
    %c5_i32 = arith.constant 5 : i32
    %36 = arith.addi %0, %c5_i32 : i32
    %37 = arith.index_cast %36 : i32 to index
    %38 = memref.load %arg1[%37] : memref<16xi32, #tpu.memory_space<smem>>
    %c5_i32_20 = arith.constant 5 : i32
    %c0_i32_21 = arith.constant 0 : i32
    %39 = tpu.memref_slice %arg2[%38, %c0_i32_21] : memref<64x128xf32, #tpu.memory_space<any>> -> memref<1x128xf32, #tpu.memory_space<any>>
    %c5_i32_22 = arith.constant 5 : i32
    %c0_i32_23 = arith.constant 0 : i32
    %40 = tpu.memref_slice %arg4[%c5_i32_22, %c0_i32_23] : memref<8x128xf32, #tpu.memory_space<vmem>> -> memref<1x128xf32, #tpu.memory_space<vmem>>
    %41 = tpu.memref_slice %arg5[%c5_i32_20] : memref<8x!tpu.dma_semaphore, #tpu.memory_space<semaphore_mem>> -> memref<1x!tpu.dma_semaphore, #tpu.memory_space<semaphore_mem>>
    %42 = tpu.memref_squeeze %41 : memref<1x!tpu.dma_semaphore, #tpu.memory_space<semaphore_mem>> -> memref<!tpu.dma_semaphore, #tpu.memory_space<semaphore_mem>>
    tpu.enqueue_dma source(%39 : memref<1x128xf32, #tpu.memory_space<any>>) target(%40 : memref<1x128xf32, #tpu.memory_space<vmem>>) target_semaphore(%42 : memref<!tpu.dma_semaphore, #tpu.memory_space<semaphore_mem>>)
    %c6_i32 = arith.constant 6 : i32
    %43 = arith.addi %0, %c6_i32 : i32
    %44 = arith.index_cast %43 : i32 to index
    %45 = memref.load %arg1[%44] : memref<16xi32, #tpu.memory_space<smem>>
    %c6_i32_24 = arith.constant 6 : i32
    %c0_i32_25 = arith.constant 0 : i32
    %46 = tpu.memref_slice %arg2[%45, %c0_i32_25] : memref<64x128xf32, #tpu.memory_space<any>> -> memref<1x128xf32, #tpu.memory_space<any>>
    %c6_i32_26 = arith.constant 6 : i32
    %c0_i32_27 = arith.constant 0 : i32
    %47 = tpu.memref_slice %arg4[%c6_i32_26, %c0_i32_27] : memref<8x128xf32, #tpu.memory_space<vmem>> -> memref<1x128xf32, #tpu.memory_space<vmem>>
    %48 = tpu.memref_slice %arg5[%c6_i32_24] : memref<8x!tpu.dma_semaphore, #tpu.memory_space<semaphore_mem>> -> memref<1x!tpu.dma_semaphore, #tpu.memory_space<semaphore_mem>>
    %49 = tpu.memref_squeeze %48 : memref<1x!tpu.dma_semaphore, #tpu.memory_space<semaphore_mem>> -> memref<!tpu.dma_semaphore, #tpu.memory_space<semaphore_mem>>
    tpu.enqueue_dma source(%46 : memref<1x128xf32, #tpu.memory_space<any>>) target(%47 : memref<1x128xf32, #tpu.memory_space<vmem>>) target_semaphore(%49 : memref<!tpu.dma_semaphore, #tpu.memory_space<semaphore_mem>>)
    %c7_i32 = arith.constant 7 : i32
    %50 = arith.addi %0, %c7_i32 : i32
    %51 = arith.index_cast %50 : i32 to index
    %52 = memref.load %arg1[%51] : memref<16xi32, #tpu.memory_space<smem>>
    %c7_i32_28 = arith.constant 7 : i32
    %c0_i32_29 = arith.constant 0 : i32
    %53 = tpu.memref_slice %arg2[%52, %c0_i32_29] : memref<64x128xf32, #tpu.memory_space<any>> -> memref<1x128xf32, #tpu.memory_space<any>>
    %c7_i32_30 = arith.constant 7 : i32
    %c0_i32_31 = arith.constant 0 : i32
    %54 = tpu.memref_slice %arg4[%c7_i32_30, %c0_i32_31] : memref<8x128xf32, #tpu.memory_space<vmem>> -> memref<1x128xf32, #tpu.memory_space<vmem>>
    %55 = tpu.memref_slice %arg5[%c7_i32_28] : memref<8x!tpu.dma_semaphore, #tpu.memory_space<semaphore_mem>> -> memref<1x!tpu.dma_semaphore, #tpu.memory_space<semaphore_mem>>
    %56 = tpu.memref_squeeze %55 : memref<1x!tpu.dma_semaphore, #tpu.memory_space<semaphore_mem>> -> memref<!tpu.dma_semaphore, #tpu.memory_space<semaphore_mem>>
    tpu.enqueue_dma source(%53 : memref<1x128xf32, #tpu.memory_space<any>>) target(%54 : memref<1x128xf32, #tpu.memory_space<vmem>>) target_semaphore(%56 : memref<!tpu.dma_semaphore, #tpu.memory_space<semaphore_mem>>)
    %c0_i32_32 = arith.constant 0 : i32
    %c0_i32_33 = arith.constant 0 : i32
    %57 = tpu.memref_slice %arg2[%3, %c0_i32_33] : memref<64x128xf32, #tpu.memory_space<any>> -> memref<1x128xf32, #tpu.memory_space<any>>
    %c0_i32_34 = arith.constant 0 : i32
    %c0_i32_35 = arith.constant 0 : i32
    %58 = tpu.memref_slice %arg4[%c0_i32_34, %c0_i32_35] : memref<8x128xf32, #tpu.memory_space<vmem>> -> memref<1x128xf32, #tpu.memory_space<vmem>>
    %59 = tpu.memref_slice %arg5[%c0_i32_32] : memref<8x!tpu.dma_semaphore, #tpu.memory_space<semaphore_mem>> -> memref<1x!tpu.dma_semaphore, #tpu.memory_space<semaphore_mem>>
    %60 = tpu.memref_squeeze %59 : memref<1x!tpu.dma_semaphore, #tpu.memory_space<semaphore_mem>> -> memref<!tpu.dma_semaphore, #tpu.memory_space<semaphore_mem>>
    tpu.wait_dma2 semaphore(%60 : memref<!tpu.dma_semaphore, #tpu.memory_space<semaphore_mem>>) src(%57 : memref<1x128xf32, #tpu.memory_space<any>>) dst(%58 : memref<1x128xf32, #tpu.memory_space<vmem>>)
    %c1_i32_36 = arith.constant 1 : i32
    %c0_i32_37 = arith.constant 0 : i32
    %61 = tpu.memref_slice %arg2[%10, %c0_i32_37] : memref<64x128xf32, #tpu.memory_space<any>> -> memref<1x128xf32, #tpu.memory_space<any>>
    %c1_i32_38 = arith.constant 1 : i32
    %c0_i32_39 = arith.constant 0 : i32
    %62 = tpu.memref_slice %arg4[%c1_i32_38, %c0_i32_39] : memref<8x128xf32, #tpu.memory_space<vmem>> -> memref<1x128xf32, #tpu.memory_space<vmem>>
    %63 = tpu.memref_slice %arg5[%c1_i32_36] : memref<8x!tpu.dma_semaphore, #tpu.memory_space<semaphore_mem>> -> memref<1x!tpu.dma_semaphore, #tpu.memory_space<semaphore_mem>>
    %64 = tpu.memref_squeeze %63 : memref<1x!tpu.dma_semaphore, #tpu.memory_space<semaphore_mem>> -> memref<!tpu.dma_semaphore, #tpu.memory_space<semaphore_mem>>
    tpu.wait_dma2 semaphore(%64 : memref<!tpu.dma_semaphore, #tpu.memory_space<semaphore_mem>>) src(%61 : memref<1x128xf32, #tpu.memory_space<any>>) dst(%62 : memref<1x128xf32, #tpu.memory_space<vmem>>)
    %c2_i32_40 = arith.constant 2 : i32
    %c0_i32_41 = arith.constant 0 : i32
    %65 = tpu.memref_slice %arg2[%17, %c0_i32_41] : memref<64x128xf32, #tpu.memory_space<any>> -> memref<1x128xf32, #tpu.memory_space<any>>
    %c2_i32_42 = arith.constant 2 : i32
    %c0_i32_43 = arith.constant 0 : i32
    %66 = tpu.memref_slice %arg4[%c2_i32_42, %c0_i32_43] : memref<8x128xf32, #tpu.memory_space<vmem>> -> memref<1x128xf32, #tpu.memory_space<vmem>>
    %67 = tpu.memref_slice %arg5[%c2_i32_40] : memref<8x!tpu.dma_semaphore, #tpu.memory_space<semaphore_mem>> -> memref<1x!tpu.dma_semaphore, #tpu.memory_space<semaphore_mem>>
    %68 = tpu.memref_squeeze %67 : memref<1x!tpu.dma_semaphore, #tpu.memory_space<semaphore_mem>> -> memref<!tpu.dma_semaphore, #tpu.memory_space<semaphore_mem>>
    tpu.wait_dma2 semaphore(%68 : memref<!tpu.dma_semaphore, #tpu.memory_space<semaphore_mem>>) src(%65 : memref<1x128xf32, #tpu.memory_space<any>>) dst(%66 : memref<1x128xf32, #tpu.memory_space<vmem>>)
    %c3_i32_44 = arith.constant 3 : i32
    %c0_i32_45 = arith.constant 0 : i32
    %69 = tpu.memref_slice %arg2[%24, %c0_i32_45] : memref<64x128xf32, #tpu.memory_space<any>> -> memref<1x128xf32, #tpu.memory_space<any>>
    %c3_i32_46 = arith.constant 3 : i32
    %c0_i32_47 = arith.constant 0 : i32
    %70 = tpu.memref_slice %arg4[%c3_i32_46, %c0_i32_47] : memref<8x128xf32, #tpu.memory_space<vmem>> -> memref<1x128xf32, #tpu.memory_space<vmem>>
    %71 = tpu.memref_slice %arg5[%c3_i32_44] : memref<8x!tpu.dma_semaphore, #tpu.memory_space<semaphore_mem>> -> memref<1x!tpu.dma_semaphore, #tpu.memory_space<semaphore_mem>>
    %72 = tpu.memref_squeeze %71 : memref<1x!tpu.dma_semaphore, #tpu.memory_space<semaphore_mem>> -> memref<!tpu.dma_semaphore, #tpu.memory_space<semaphore_mem>>
    tpu.wait_dma2 semaphore(%72 : memref<!tpu.dma_semaphore, #tpu.memory_space<semaphore_mem>>) src(%69 : memref<1x128xf32, #tpu.memory_space<any>>) dst(%70 : memref<1x128xf32, #tpu.memory_space<vmem>>)
    %c4_i32_48 = arith.constant 4 : i32
    %c0_i32_49 = arith.constant 0 : i32
    %73 = tpu.memref_slice %arg2[%31, %c0_i32_49] : memref<64x128xf32, #tpu.memory_space<any>> -> memref<1x128xf32, #tpu.memory_space<any>>
    %c4_i32_50 = arith.constant 4 : i32
    %c0_i32_51 = arith.constant 0 : i32
    %74 = tpu.memref_slice %arg4[%c4_i32_50, %c0_i32_51] : memref<8x128xf32, #tpu.memory_space<vmem>> -> memref<1x128xf32, #tpu.memory_space<vmem>>
    %75 = tpu.memref_slice %arg5[%c4_i32_48] : memref<8x!tpu.dma_semaphore, #tpu.memory_space<semaphore_mem>> -> memref<1x!tpu.dma_semaphore, #tpu.memory_space<semaphore_mem>>
    %76 = tpu.memref_squeeze %75 : memref<1x!tpu.dma_semaphore, #tpu.memory_space<semaphore_mem>> -> memref<!tpu.dma_semaphore, #tpu.memory_space<semaphore_mem>>
    tpu.wait_dma2 semaphore(%76 : memref<!tpu.dma_semaphore, #tpu.memory_space<semaphore_mem>>) src(%73 : memref<1x128xf32, #tpu.memory_space<any>>) dst(%74 : memref<1x128xf32, #tpu.memory_space<vmem>>)
    %c5_i32_52 = arith.constant 5 : i32
    %c0_i32_53 = arith.constant 0 : i32
    %77 = tpu.memref_slice %arg2[%38, %c0_i32_53] : memref<64x128xf32, #tpu.memory_space<any>> -> memref<1x128xf32, #tpu.memory_space<any>>
    %c5_i32_54 = arith.constant 5 : i32
    %c0_i32_55 = arith.constant 0 : i32
    %78 = tpu.memref_slice %arg4[%c5_i32_54, %c0_i32_55] : memref<8x128xf32, #tpu.memory_space<vmem>> -> memref<1x128xf32, #tpu.memory_space<vmem>>
    %79 = tpu.memref_slice %arg5[%c5_i32_52] : memref<8x!tpu.dma_semaphore, #tpu.memory_space<semaphore_mem>> -> memref<1x!tpu.dma_semaphore, #tpu.memory_space<semaphore_mem>>
    %80 = tpu.memref_squeeze %79 : memref<1x!tpu.dma_semaphore, #tpu.memory_space<semaphore_mem>> -> memref<!tpu.dma_semaphore, #tpu.memory_space<semaphore_mem>>
    tpu.wait_dma2 semaphore(%80 : memref<!tpu.dma_semaphore, #tpu.memory_space<semaphore_mem>>) src(%77 : memref<1x128xf32, #tpu.memory_space<any>>) dst(%78 : memref<1x128xf32, #tpu.memory_space<vmem>>)
    %c6_i32_56 = arith.constant 6 : i32
    %c0_i32_57 = arith.constant 0 : i32
    %81 = tpu.memref_slice %arg2[%45, %c0_i32_57] : memref<64x128xf32, #tpu.memory_space<any>> -> memref<1x128xf32, #tpu.memory_space<any>>
    %c6_i32_58 = arith.constant 6 : i32
    %c0_i32_59 = arith.constant 0 : i32
    %82 = tpu.memref_slice %arg4[%c6_i32_58, %c0_i32_59] : memref<8x128xf32, #tpu.memory_space<vmem>> -> memref<1x128xf32, #tpu.memory_space<vmem>>
    %83 = tpu.memref_slice %arg5[%c6_i32_56] : memref<8x!tpu.dma_semaphore, #tpu.memory_space<semaphore_mem>> -> memref<1x!tpu.dma_semaphore, #tpu.memory_space<semaphore_mem>>
    %84 = tpu.memref_squeeze %83 : memref<1x!tpu.dma_semaphore, #tpu.memory_space<semaphore_mem>> -> memref<!tpu.dma_semaphore, #tpu.memory_space<semaphore_mem>>
    tpu.wait_dma2 semaphore(%84 : memref<!tpu.dma_semaphore, #tpu.memory_space<semaphore_mem>>) src(%81 : memref<1x128xf32, #tpu.memory_space<any>>) dst(%82 : memref<1x128xf32, #tpu.memory_space<vmem>>)
    %c7_i32_60 = arith.constant 7 : i32
    %c0_i32_61 = arith.constant 0 : i32
    %85 = tpu.memref_slice %arg2[%52, %c0_i32_61] : memref<64x128xf32, #tpu.memory_space<any>> -> memref<1x128xf32, #tpu.memory_space<any>>
    %c7_i32_62 = arith.constant 7 : i32
    %c0_i32_63 = arith.constant 0 : i32
    %86 = tpu.memref_slice %arg4[%c7_i32_62, %c0_i32_63] : memref<8x128xf32, #tpu.memory_space<vmem>> -> memref<1x128xf32, #tpu.memory_space<vmem>>
    %87 = tpu.memref_slice %arg5[%c7_i32_60] : memref<8x!tpu.dma_semaphore, #tpu.memory_space<semaphore_mem>> -> memref<1x!tpu.dma_semaphore, #tpu.memory_space<semaphore_mem>>
    %88 = tpu.memref_squeeze %87 : memref<1x!tpu.dma_semaphore, #tpu.memory_space<semaphore_mem>> -> memref<!tpu.dma_semaphore, #tpu.memory_space<semaphore_mem>>
    tpu.wait_dma2 semaphore(%88 : memref<!tpu.dma_semaphore, #tpu.memory_space<semaphore_mem>>) src(%85 : memref<1x128xf32, #tpu.memory_space<any>>) dst(%86 : memref<1x128xf32, #tpu.memory_space<vmem>>)
    %c0 = arith.constant 0 : index
    %c0_64 = arith.constant 0 : index
    %89 = vector.load %arg4[%c0, %c0_64] : memref<8x128xf32, #tpu.memory_space<vmem>>, vector<8x128xf32>
    %c0_65 = arith.constant 0 : index
    %c0_66 = arith.constant 0 : index
    %90 = vector.load %arg3[%c0_65, %c0_66] : memref<8x128xf32, #tpu.memory_space<vmem>>, vector<8x128xf32>
    tpu.vector_store %arg3[%c0_65, %c0_66], %89 {strides = array<i32>} : memref<8x128xf32, #tpu.memory_space<vmem>>, vector<8x128xf32>,
    return
  }
  func.func @transform_1(%arg0: i32, %arg1: memref<16xi32, #tpu.memory_space<smem>>) -> (i32, i32) {
    %c0_i32 = arith.constant 0 : i32
    %c0_i32_0 = arith.constant 0 : i32
    return %arg0, %c0_i32 : i32, i32
  }
}

</mosaic_0001>

<bundles_post_ra>
// kernel: tpu_custom_call.1
= control target key start
LH: loop header
LB: loop body
LE: loop exit
PB: predicated region body
PF: predicated region fallthrough
CT: control target
= control target key end

     0   :  { %s926_s0 = inlined_call_operand.hbm [shape: s32[16], index: 0, kind: input, shape index: {}]   ;;  %s927_s1 = inlined_call_operand.hbm [shape: f32[64,128], index: 1, kind: input, shape index: {}]   ;;  %s928_s2 = inlined_call_operand.hbm [shape: f32[16,128], index: 2, kind: output, shape index: {}]  }
   0x1   :  { %s398_s11 = scalar_lea.hbm %s926_s0, 16 }
   0x2   :  { %p399_p0 = scmp.ne.s32.totalorder %s926_s0, %s398_s11  ;;  %p402_p1 = scmp.lt.u32.totalorder %s398_s11, %s926_s0 }
   0x4   :  { %p404_p2 = pnand %p402_p1, %p399_p0 }
   0x6   :  { %407 = shalt.err (!%p404_p2)  }
   0x7   :  { %s674_s16 = smov [#allocation5]  }
   0x8   :  { %8 = dma.hbm_to_smem %s926_s0, 16, %s674_s16, [#allocation4] }
   0x9   :  { %640 = dma.done.wait [#allocation4], 16 }
   0xa   :  { %641 = vsyncadd [#allocation4], 4294967280 }
   0xb   :  { %10 = sfence }
   0xc   :  { %11 = vsyncpa [#allocation7], 0 }
   0xd   :  { %13 = vsyncpa [#allocation7 + $0x1], 0  ;;  %s711_s19 = smov 0   ;;  %s713_s20 = smov 0  }
   0xe   :  { %s715_s21 = smov 0  }
   0xf LB: > { %s333_s0 = sadd.s32 4294967295, %s672_s21   ;;  %s728_s22 = sadd.s32 1, %s672_s21   ;;  %s672_s21 = sphi %s715_s21, %s933_s21   ;;  %s668_s20 = sphi %s713_s20, %s932_s20   ;;  %s664_s19 = sphi %s711_s19, %s931_s19  }
  0x10   : > { %s22_s23 = ssub.s32 %s672_s21, %s728_s22  ;;  %s25_s24 = sadd.s32 1, %s668_s20 }
  0x11   : > { %p23_p3 = scmp.eq.s32.totalorder %s22_s23, 0  ;;  %p334_p4 = scmp.ne.s32.totalorder %s22_s23, 0 }
  0x12   : > { %p29_p5 = scmp.eq.s32.totalorder %s672_s21, 1  ;;  %p34_p6 = scmp.ne.s32.totalorder %s668_s20, %s664_s19 }
  0x13   : > { %s737_s25 = scalar_select %p23_p3, %s668_s20, %s25_s24  }
  0x14   : > { %p739_p7 = por %p334_p4, %p29_p5  ;;  %p35_p8 = scmp.eq.s32.totalorder %s333_s0, 1 }
  0x15   : > { %p335_p10 = scmp.ge.s32.totalorder %s672_s21, 2 }
  0x16   : > { %p743_p9 = por %p35_p8, %p34_p6  ;;  %s49_s28 = sand.u32 (!%p335_p10), 1, %s668_s20  }
  0x17   : > { %44 = sbr.rel (%p335_p10) target bundleno = 244 (0xf4), region = 12  ;;  %s750_s29 = sshll.u32 (!%p335_p10), %s672_s21, 3 }
  0x18   : > { %s754_s30 = sshll.u32 (!%p335_p10), %s49_s28, 3  ;;  %s53_s3 = sld [smem:[#allocation5 + %s750_s29]] (!%p335_p10) }
  0x19   : > { %s675_s4 = smov (!%p335_p10), [#allocation2]   ;;  %s67_s6 = sadd.s32 (!%p335_p10), 1, %s750_s29 }
  0x1a   : > { %s63_s5 = sshll.u32 (!%p335_p10), %s675_s4, 4  ;;  %s760_s7 = sld [smem:[#allocation5 + %s67_s6]] (!%p335_p10)  ;;  %s758_s5 = int_to_ptr.vmem [resolvable:$true] %s63_s5 }
  0x1b   : > { %s84_s8 = sadd.s32 (!%p335_p10), 2, %s750_s29  ;;  %s676_s9 = smov (!%p335_p10), [#allocation2 + $0x1]  }
  0x1c   : > { %s80_s10 = sshll.u32 (!%p335_p10), %s676_s9, 4  ;;  %s763_s11 = sld [smem:[#allocation5 + %s84_s8]] (!%p335_p10)  ;;  %s765_s10 = int_to_ptr.vmem [resolvable:$true] %s80_s10 }
  0x1d   : > { %s773_s0 = scalar_lea.hbm (!%p335_p10), %s927_s1, 1024 }
  0x1e   : > { %s338_s12 = sshll.u32 %s53_s3, 4 }
  0x1f   : > { %s55_s15 = scalar_lea.hbm %s927_s1, %s338_s12 }
  0x20   : > { %s408_s16 = scalar_lea.hbm %s55_s15, 16  ;;  %p411_p12 = scmp.lt.u32.totalorder %s55_s15, %s927_s1 }
  0x21   : > { %p409_p11 = scmp.ne.s32.totalorder %s55_s15, %s408_s16  ;;  %p412_p13 = scmp.lt.u32.totalorder %s773_s0, %s408_s16 }
  0x22   : > { %p414_p1 = scmp.lt.u32.totalorder %s408_s16, %s55_s15 }
  0x23   : > { %p413_p0 = por %p412_p13, %p411_p12 }
  0x25   : > { %p415_p2 = por %p414_p1, %p413_p0 }
  0x27   : > { %p416_p3 = pnand %p415_p2, %p409_p11 }
  0x29   : > { %419 = shalt.err (!%p416_p3)  }
  0x2a   : > { %s420_s3 = scalar_lea.vmem %s758_s5, 16  ;;  %s782_s4 = scalar_lea.vmem %s758_s5, 128 }
  0x2b   : > { %p421_p4 = scmp.ne.s32.totalorder %s758_s5, %s420_s3  ;;  %p425_p5 = scmp.lt.s32.totalorder %s758_s5, %s758_s5 }
  0x2c   : > { %p426_p6 = scmp.lt.s32.totalorder %s782_s4, %s420_s3 }
  0x2e   : > { %p427_p8 = por %p426_p6, %p425_p5 }
  0x30   : > { %p428_p10 = pnand %p427_p8, %p421_p4 }
  0x32   : > { %431 = shalt.err (!%p428_p10)  }
  0x33   : > { %66 = dma.hbm_to_vmem [thread:$0]  %s55_s15, 16, %s758_s5, [#allocation3] }
  0x34   : > { %s339_s6 = sshll.u32 %s760_s7, 4  ;;  %s677_s8 = smov [#allocation2 + $0x2]  }
  0x35   : > { %s97_s9 = sshll.u32 %s677_s8, 4  ;;  %s70_s14 = scalar_lea.hbm %s927_s1, %s339_s6  ;;  %s792_s9 = int_to_ptr.vmem [resolvable:$true] %s97_s9 }
  0x36   : > { %s432_s16 = scalar_lea.hbm %s70_s14, 16  ;;  %p435_p12 = scmp.lt.u32.totalorder %s70_s14, %s927_s1 }
  0x37   : > { %p433_p11 = scmp.ne.s32.totalorder %s70_s14, %s432_s16  ;;  %p436_p13 = scmp.lt.u32.totalorder %s773_s0, %s432_s16 }
  0x38   : > { %p438_p1 = scmp.lt.u32.totalorder %s432_s16, %s70_s14 }
  0x39   : > { %p437_p0 = por %p436_p13, %p435_p12 }
  0x3b   : > { %p439_p2 = por %p438_p1, %p437_p0 }
  0x3d   : > { %p440_p3 = pnand %p439_p2, %p433_p11 }
  0x3f   : > { %443 = shalt.err (!%p440_p3)  }
  0x40   : > { %s444_s7 = scalar_lea.vmem %s765_s10, 16  ;;  %p449_p5 = scmp.lt.s32.totalorder %s765_s10, %s758_s5 }
  0x41   : > { %p445_p4 = scmp.ne.s32.totalorder %s765_s10, %s444_s7  ;;  %p450_p6 = scmp.lt.s32.totalorder %s782_s4, %s444_s7 }
  0x43   : > { %p451_p8 = por %p450_p6, %p449_p5 }
  0x45   : > { %p452_p10 = pnand %p451_p8, %p445_p4 }
  0x47   : > { %455 = shalt.err (!%p452_p10)  }
  0x48   : > { %83 = dma.hbm_to_vmem [thread:$0]  %s70_s14, 16, %s765_s10, [#allocation3 + $0x1] }
  0x49   : > { %s340_s15 = sshll.u32 %s763_s11, 4  ;;  %s101_s23 = sadd.s32 3, %s750_s29 }
  0x4a   : > { %s87_s6 = scalar_lea.hbm %s927_s1, %s340_s15  ;;  %s809_s8 = sld [smem:[#allocation5 + %s101_s23]] }
  0x4b   : > { %s456_s12 = scalar_lea.hbm %s87_s6, 16  ;;  %p459_p12 = scmp.lt.u32.totalorder %s87_s6, %s927_s1 }
  0x4c   : > { %p457_p11 = scmp.ne.s32.totalorder %s87_s6, %s456_s12  ;;  %p460_p13 = scmp.lt.u32.totalorder %s773_s0, %s456_s12 }
  0x4d   : > { %p462_p1 = scmp.lt.u32.totalorder %s456_s12, %s87_s6 }
  0x4e   : > { %p461_p0 = por %p460_p13, %p459_p12 }
  0x50   : > { %p463_p2 = por %p462_p1, %p461_p0 }
  0x52   : > { %p464_p3 = pnand %p463_p2, %p457_p11 }
  0x54   : > { %467 = shalt.err (!%p464_p3)  }
  0x55   : > { %s468_s10 = scalar_lea.vmem %s792_s9, 16  ;;  %p473_p5 = scmp.lt.s32.totalorder %s792_s9, %s758_s5 }
  0x56   : > { %p469_p4 = scmp.ne.s32.totalorder %s792_s9, %s468_s10  ;;  %p474_p6 = scmp.lt.s32.totalorder %s782_s4, %s468_s10 }
  0x58   : > { %p475_p8 = por %p474_p6, %p473_p5 }
  0x5a   : > { %p476_p10 = pnand %p475_p8, %p469_p4 }
  0x5c   : > { %479 = shalt.err (!%p476_p10)  }
  0x5d   : > { %100 = dma.hbm_to_vmem [thread:$0]  %s87_s6, 16, %s792_s9, [#allocation3 + $0x2] }
  0x5e   : > { %s118_s11 = sadd.s32 4, %s750_s29  ;;  %s678_s14 = smov [#allocation2 + $0x3]  }
  0x5f   : > { %s114_s17 = sshll.u32 %s678_s14, 4  ;;  %s119_s18 = sld [smem:[#allocation5 + %s118_s11]]  ;;  %s115_s17 = int_to_ptr.vmem [resolvable:$true] %s114_s17 }
  0x60   : > { %s679_s7 = smov [#allocation2 + $0x4]   ;;  %s135_s23 = sadd.s32 5, %s750_s29 }
  0x61   : > { %s131_s15 = sshll.u32 %s679_s7, 4  ;;  %s341_s24 = sshll.u32 %s809_s8, 4  ;;  %s824_s15 = int_to_ptr.vmem [resolvable:$true] %s131_s15 }
  0x62   : > { %s104_s13 = scalar_lea.hbm %s927_s1, %s341_s24  ;;  %s829_s16 = sld [smem:[#allocation5 + %s135_s23]] }
  0x63   : > { %s480_s10 = scalar_lea.hbm %s104_s13, 16  ;;  %p483_p12 = scmp.lt.u32.totalorder %s104_s13, %s927_s1 }
  0x64   : > { %p481_p11 = scmp.ne.s32.totalorder %s104_s13, %s480_s10  ;;  %p484_p13 = scmp.lt.u32.totalorder %s773_s0, %s480_s10 }
  0x65   : > { %p486_p1 = scmp.lt.u32.totalorder %s480_s10, %s104_s13 }
  0x66   : > { %p485_p0 = por %p484_p13, %p483_p12 }
  0x68   : > { %p487_p2 = por %p486_p1, %p485_p0 }
  0x6a   : > { %p488_p3 = pnand %p487_p2, %p481_p11 }
  0x6c   : > { %491 = shalt.err (!%p488_p3)  }
  0x6d   : > { %s492_s8 = scalar_lea.vmem %s115_s17, 16  ;;  %p497_p5 = scmp.lt.s32.totalorder %s115_s17, %s758_s5 }
  0x6e   : > { %p493_p4 = scmp.ne.s32.totalorder %s115_s17, %s492_s8  ;;  %p498_p6 = scmp.lt.s32.totalorder %s782_s4, %s492_s8 }
  0x70   : > { %p499_p8 = por %p498_p6, %p497_p5 }
  0x72   : > { %p500_p10 = pnand %p499_p8, %p493_p4 }
  0x74   : > { %503 = shalt.err (!%p500_p10)  }
  0x75   : > { %117 = dma.hbm_to_vmem [thread:$0]  %s104_s13, 16, %s115_s17, [#allocation3 + $0x3] }
  0x76   : > { %s342_s11 = sshll.u32 %s119_s18, 4  ;;  %s680_s24 = smov [#allocation2 + $0x5]  }
  0x77   : > { %s121_s23 = scalar_lea.hbm %s927_s1, %s342_s11  ;;  %s148_s3 = sshll.u32 %s680_s24, 4  ;;  %s149_s3 = int_to_ptr.vmem [resolvable:$true] %s148_s3 }
  0x78   : > { %s504_s12 = scalar_lea.hbm %s121_s23, 16  ;;  %p507_p12 = scmp.lt.u32.totalorder %s121_s23, %s927_s1 }
  0x79   : > { %p505_p11 = scmp.ne.s32.totalorder %s121_s23, %s504_s12  ;;  %p508_p13 = scmp.lt.u32.totalorder %s773_s0, %s504_s12 }
  0x7a   : > { %p510_p1 = scmp.lt.u32.totalorder %s504_s12, %s121_s23 }
  0x7b   : > { %p509_p0 = por %p508_p13, %p507_p12 }
  0x7d   : > { %p511_p2 = por %p510_p1, %p509_p0 }
  0x7f   : > { %p512_p3 = pnand %p511_p2, %p505_p11 }
  0x81   : > { %515 = shalt.err (!%p512_p3)  }
  0x82   : > { %s516_s17 = scalar_lea.vmem %s824_s15, 16  ;;  %p521_p5 = scmp.lt.s32.totalorder %s824_s15, %s758_s5 }
  0x83   : > { %p517_p4 = scmp.ne.s32.totalorder %s824_s15, %s516_s17  ;;  %p522_p6 = scmp.lt.s32.totalorder %s782_s4, %s516_s17 }
  0x85   : > { %p523_p8 = por %p522_p6, %p521_p5 }
  0x87   : > { %p524_p10 = pnand %p523_p8, %p517_p4 }
  0x89   : > { %527 = shalt.err (!%p524_p10)  }
  0x8a   : > { %134 = dma.hbm_to_vmem [thread:$0]  %s121_s23, 16, %s824_s15, [#allocation3 + $0x4] }
  0x8b   : > { %s152_s18 = sadd.s32 6, %s750_s29  ;;  %s343_s13 = sshll.u32 %s829_s16, 4 }
  0x8c   : > { %s153_s6 = sld [smem:[#allocation5 + %s152_s18]]  ;;  %s138_s14 = scalar_lea.hbm %s927_s1, %s343_s13 }
  0x8d   : > { %s528_s7 = scalar_lea.hbm %s138_s14, 16  ;;  %p531_p12 = scmp.lt.u32.totalorder %s138_s14, %s927_s1 }
  0x8e   : > { %p529_p11 = scmp.ne.s32.totalorder %s138_s14, %s528_s7  ;;  %p532_p13 = scmp.lt.u32.totalorder %s773_s0, %s528_s7 }
  0x8f   : > { %p534_p1 = scmp.lt.u32.totalorder %s528_s7, %s138_s14 }
  0x90   : > { %p533_p0 = por %p532_p13, %p531_p12 }
  0x92   : > { %p535_p2 = por %p534_p1, %p533_p0 }
  0x94   : > { %p536_p3 = pnand %p535_p2, %p529_p11 }
  0x96   : > { %539 = shalt.err (!%p536_p3)  }
  0x97   : > { %s540_s15 = scalar_lea.vmem %s149_s3, 16  ;;  %p545_p5 = scmp.lt.s32.totalorder %s149_s3, %s758_s5 }
  0x98   : > { %p541_p4 = scmp.ne.s32.totalorder %s149_s3, %s540_s15  ;;  %p546_p6 = scmp.lt.s32.totalorder %s782_s4, %s540_s15 }
  0x9a   : > { %p547_p8 = por %p546_p6, %p545_p5 }
  0x9c   : > { %p548_p10 = pnand %p547_p8, %p541_p4 }
  0x9e   : > { %551 = shalt.err (!%p548_p10)  }
  0x9f   : > { %151 = dma.hbm_to_vmem [thread:$0]  %s138_s14, 16, %s149_s3, [#allocation3 + $0x5] }
  0xa0   : > { %s681_s16 = smov [#allocation2 + $0x6]   ;;  %s169_s10 = sadd.s32 7, %s750_s29 }
  0xa1   : > { %s165_s23 = sshll.u32 %s681_s16, 4  ;;  %s170_s9 = sld [smem:[#allocation5 + %s169_s10]]  ;;  %s166_s23 = int_to_ptr.vmem [resolvable:$true] %s165_s23 }
  0xa2   : > { %s344_s17 = sshll.u32 %s153_s6, 4  ;;  %s682_s18 = smov [#allocation2 + $0x7]  }
  0xa3   : > { %s182_s13 = sshll.u32 %s682_s18, 4  ;;  %s155_s7 = scalar_lea.hbm %s927_s1, %s344_s17  ;;  %s183_s13 = int_to_ptr.vmem [resolvable:$true] %s182_s13 }
  0xa4   : > { %s552_s24 = scalar_lea.hbm %s155_s7, 16  ;;  %p555_p12 = scmp.lt.u32.totalorder %s155_s7, %s927_s1 }
  0xa5   : > { %p553_p11 = scmp.ne.s32.totalorder %s155_s7, %s552_s24  ;;  %p556_p13 = scmp.lt.u32.totalorder %s773_s0, %s552_s24 }
  0xa6   : > { %p558_p1 = scmp.lt.u32.totalorder %s552_s24, %s155_s7 }
  0xa7   : > { %p557_p0 = por %p556_p13, %p555_p12 }
  0xa9   : > { %p559_p2 = por %p558_p1, %p557_p0 }
  0xab   : > { %p560_p3 = pnand %p559_p2, %p553_p11 }
  0xad   : > { %563 = shalt.err (!%p560_p3)  }
  0xae   : > { %s564_s29 = scalar_lea.vmem %s166_s23, 16  ;;  %p569_p5 = scmp.lt.s32.totalorder %s166_s23, %s758_s5 }
  0xaf   : > { %p565_p4 = scmp.ne.s32.totalorder %s166_s23, %s564_s29  ;;  %p570_p6 = scmp.lt.s32.totalorder %s782_s4, %s564_s29 }
  0xb1   : > { %p571_p8 = por %p570_p6, %p569_p5 }
  0xb3   : > { %p572_p10 = pnand %p571_p8, %p565_p4 }
  0xb5   : > { %575 = shalt.err (!%p572_p10)  }
  0xb6   : > { %168 = dma.hbm_to_vmem [thread:$0]  %s155_s7, 16, %s166_s23, [#allocation3 + $0x6] }
  0xb7   : > { %s345_s3 = sshll.u32 %s170_s9, 4 }
  0xb8   : > { %s172_s16 = scalar_lea.hbm %s927_s1, %s345_s3 }
  0xb9   : > { %s576_s10 = scalar_lea.hbm %s172_s16, 16  ;;  %p579_p12 = scmp.lt.u32.totalorder %s172_s16, %s927_s1 }
  0xba   : > { %p577_p11 = scmp.ne.s32.totalorder %s172_s16, %s576_s10  ;;  %p580_p13 = scmp.lt.u32.totalorder %s773_s0, %s576_s10 }
  0xbb   : > { %p582_p1 = scmp.lt.u32.totalorder %s576_s10, %s172_s16 }
  0xbc   : > { %p581_p0 = por %p580_p13, %p579_p12 }
  0xbe   : > { %p583_p2 = por %p582_p1, %p581_p0 }
  0xc0   : > { %p584_p3 = pnand %p583_p2, %p577_p11 }
  0xc2   : > { %587 = shalt.err (!%p584_p3)  }
  0xc3   : > { %s588_s23 = scalar_lea.vmem %s183_s13, 16  ;;  %p593_p5 = scmp.lt.s32.totalorder %s183_s13, %s758_s5 }
  0xc4   : > { %p589_p4 = scmp.ne.s32.totalorder %s183_s13, %s588_s23  ;;  %p594_p6 = scmp.lt.s32.totalorder %s782_s4, %s588_s23 }
  0xc6   : > { %p595_p8 = por %p594_p6, %p593_p5 }
  0xc8   : > { %p596_p10 = pnand %p595_p8, %p589_p4 }
  0xca   : > { %599 = shalt.err (!%p596_p10)  }
  0xcb   : > { %185 = dma.hbm_to_vmem [thread:$0]  %s172_s16, 16, %s183_s13, [#allocation3 + $0x7] }
  0xcc   : > { %s51_s9 = scalar_lea.vmem [#allocation6], %s754_s30 }
  0xcd   : > { %642 = dma.done.wait [#allocation3], 16 }
  0xce   : > { %643 = vsyncadd [#allocation3], 4294967280 }
  0xcf   : > { %644 = dma.done.wait [#allocation3 + $0x1], 16 }
  0xd0   : > { %645 = vsyncadd [#allocation3 + $0x1], 4294967280 }
  0xd1   : > { %646 = dma.done.wait [#allocation3 + $0x2], 16 }
  0xd2   : > { %647 = vsyncadd [#allocation3 + $0x2], 4294967280 }
  0xd3   : > { %648 = dma.done.wait [#allocation3 + $0x3], 16 }
  0xd4   : > { %649 = vsyncadd [#allocation3 + $0x3], 4294967280 }
  0xd5   : > { %650 = dma.done.wait [#allocation3 + $0x4], 16 }
  0xd6   : > { %651 = vsyncadd [#allocation3 + $0x4], 4294967280 }
  0xd7   : > { %652 = dma.done.wait [#allocation3 + $0x5], 16 }
  0xd8   : > { %653 = vsyncadd [#allocation3 + $0x5], 4294967280 }
  0xd9   : > { %654 = dma.done.wait [#allocation3 + $0x6], 16 }
  0xda   : > { %655 = vsyncadd [#allocation3 + $0x6], 4294967280 }
  0xdb   : > { %656 = dma.done.wait [#allocation3 + $0x7], 16 }
  0xdc   : > { %657 = vsyncadd [#allocation3 + $0x7], 4294967280  ;;  %s347_s30 = sshll.u32 %s672_s21, 7  ;;  %s219_s5 = sshll.u32 %s51_s9, 4  ;;  %v203_v0 = vld [vmem:[#allocation2] sm:$0xff]  ;;  %s887_s5 = int_to_ptr.vmem [resolvable:$true] %s219_s5 }
  0xdd   : > { %s885_s13 = scalar_lea.hbm %s928_s2, %s347_s30  ;;  %204 = vst [vmem:[%s51_s9] sm:$0xff] %v203_v0  ;;  %s206_s8 = scalar_lea.sflag [#allocation7], %s49_s28 }
  0xde   : > { %s600_s11 = scalar_lea.vmem %s887_s5, 128  ;;  %s683_s7 = smov [#allocation6]  }
  0xdf   : > { %p601_p11 = scmp.ne.s32.totalorder %s887_s5, %s600_s11  ;;  %s604_s24 = sshll.u32 %s683_s7, 4  ;;  %s605_s24 = int_to_ptr.vmem [resolvable:$false] %s604_s24 }
  0xe0   : > { %s606_s12 = scalar_lea.vmem %s605_s24, 256  ;;  %p607_p0 = scmp.lt.s32.totalorder %s887_s5, %s605_s24 }
  0xe1   : > { %p602_p12 = pnand %p601_p11, %p739_p7  ;;  %p608_p1 = scmp.lt.s32.totalorder %s606_s12, %s600_s11 }
  0xe3   : > { %p603_p13 = pneg %p602_p12  ;;  %p609_p2 = por %p608_p1, %p607_p0 }
  0xe5   : > { %p610_p3 = pnand %p609_p2, %p603_p13 }
  0xe7   : > { %613 = shalt.err (!%p610_p3)
}
  0xe8   : > { %s614_s28 = scalar_lea.hbm %s885_s13, 128  ;;  %s618_s3 = scalar_lea.hbm %s928_s2, 256 }
  0xe9   : > { %p615_p4 = scmp.ne.s32.totalorder %s885_s13, %s614_s28  ;;  %p619_p8 = scmp.lt.u32.totalorder %s885_s13, %s928_s2 }
  0xea   : > { %p620_p10 = scmp.lt.u32.totalorder %s618_s3, %s614_s28  ;;  %p622_p12 = scmp.lt.u32.totalorder %s614_s28, %s885_s13 }
  0xeb   : > { %p616_p5 = pnand %p615_p4, %p739_p7 }
  0xec   : > { %p621_p11 = por %p620_p10, %p619_p8 }
  0xed   : > { %p617_p6 = pneg %p616_p5 }
  0xee   : > { %p623_p13 = por %p622_p12, %p621_p11 }
  0xf0   : > { %p624_p0 = pnand %p623_p13, %p617_p6 }
  0xf2   : > { %627 = shalt.err (!%p624_p0)
}
  0xf3   : > { %358 = dma.vmem_to_hbm [thread:$0]  (%p739_p7), %s887_s5, 128, %s885_s13, %s206_s8  }
  0xf4 PF: > { %p364_p1 = scmp.ge.s32.totalorder %s672_s21, 1  ;;  %s231_s16 = sand.u32 1, %s664_s19  }
  0xf5   : > { %s232_s10 = scalar_lea.sflag [#allocation7], %s231_s16 }
  0xf6   : > { %p361_p2 = pnand %p364_p1, %p743_p9 }
  0xf8   : > { %659 = dma.done.wait (!%p361_p2), %s232_s10, 128  }
  0xf9   : > { %661 = vsyncadd (!%p361_p2), %s232_s10, 4294967168  ;;  %p16_p3 = scmp.ge.s32.totalorder %s728_s22, 3   ;;  %s931_s19 = smov %s668_s20 }
  0xfa   : > { %s932_s20 = smov %s737_s25  ;;  %s933_s21 = smov %s728_s22 }
  0xfb   :  { %18 = sbr.rel (!%p16_p3) target bundleno = 15 (0xf), region = 105 }
 0x102   :  { %237 = vsyncpa [#allocation7], 1 }
 0x103   :  { %239 = vsyncpa [#allocation7 + $0x1], 1 }
 0x104   :  { %240 = vsyncmov [#allocation3] }
 0x107   :  { %s241_s21 = vpop.sfrf %240 }
 0x108   :  { %p350_p7 = scmp.ne.s32.totalorder %s241_s21, 0 }
 0x10a   :  { %245 = shalt.err (%p350_p7)  }
 0x10b   :  { %247 = vsyncmov [#allocation3 + $0x1] }
 0x10e   :  { %s248_s26 = vpop.sfrf %247 }
 0x10f   :  { %p351_p9 = scmp.ne.s32.totalorder %s248_s26, 0 }
 0x111   :  { %252 = shalt.err (%p351_p9)  }
 0x112   :  { %254 = vsyncmov [#allocation3 + $0x2] }
 0x115   :  { %s255_s27 = vpop.sfrf %254 }
 0x116   :  { %p352_p4 = scmp.ne.s32.totalorder %s255_s27, 0 }
 0x118   :  { %259 = shalt.err (%p352_p4)  }
 0x119   :  { %261 = vsyncmov [#allocation3 + $0x3] }
 0x11c   :  { %s262_s17 = vpop.sfrf %261 }
 0x11d   :  { %p353_p5 = scmp.ne.s32.totalorder %s262_s17, 0 }
 0x11f   :  { %266 = shalt.err (%p353_p5)  }
 0x120   :  { %268 = vsyncmov [#allocation3 + $0x4] }
 0x123   :  { %s269_s22 = vpop.sfrf %268 }
 0x124   :  { %p354_p6 = scmp.ne.s32.totalorder %s269_s22, 0 }
 0x126   :  { %273 = shalt.err (%p354_p6)  }
 0x127   :  { %275 = vsyncmov [#allocation3 + $0x5] }
 0x12a   :  { %s276_s1 = vpop.sfrf %275 }
 0x12b   :  { %p355_p8 = scmp.ne.s32.totalorder %s276_s1, 0 }
 0x12d   :  { %280 = shalt.err (%p355_p8)  }
 0x12e   :  { %282 = vsyncmov [#allocation3 + $0x6] }
 0x131   :  { %s283_s2 = vpop.sfrf %282 }
 0x132   :  { %p356_p10 = scmp.ne.s32.totalorder %s283_s2, 0 }
 0x134   :  { %287 = shalt.err (%p356_p10)  }
 0x135   :  { %289 = vsyncmov [#allocation3 + $0x7] }
 0x138   :  { %s290_s19 = vpop.sfrf %289 }
 0x139   :  { %p357_p11 = scmp.ne.s32.totalorder %s290_s19, 0 }
 0x13b   :  { %294 = shalt.err (%p357_p11)  }

</bundles_post_ra>
